<compile_context>
chip_gen: v6e
topology: v6e:2x2x1
jax: 0.10.0
libtpu: 0.0.40
codegen_flags: <defaults>
</compile_context>

<pallas_src>
import math

import jax
import jax.numpy as jnp
from jax import lax
from jax.experimental import pallas as pl
from jax.experimental.pallas import tpu as pltpu

HIDDEN = 64
_NEG_BIG = -1e30          # finite "-inf": exp(_NEG_BIG - m) underflows to exactly 0
_LANES = 128
_SUBLANES = 8
_VMEM_LIMIT_BYTES = 48 * 1024 * 1024   # safe on v5e/v6e (128 MiB) and v7x (64 MiB)
_VMEM_TILE_BUDGET = 36 * 1024 * 1024   # headroom for resident weights + compiler scratch


def _round_up(x, m):
    return ((x + m - 1) // m) * m


def gating_kernel(x_ref, w1_ref, b1_ref, w2_ref, b2_ref, o_ref):
    E = o_ref.shape[-1]
    # fc1: (TB, D) @ (D, H) + (1, H), f32 accumulation on the MXU, then ReLU.
    h = jnp.dot(x_ref[...], w1_ref[...],
                preferred_element_type=jnp.float32,
                precision=lax.Precision.HIGHEST)
    h = jnp.maximum(h + b1_ref[...], 0.0)
    # fc2 on the lane-padded expert dim; padded lanes carry a -1e30 bias.
    logits = jnp.dot(h, w2_ref[...],
                     preferred_element_type=jnp.float32,
                     precision=lax.Precision.HIGHEST)
    logits = logits + b2_ref[...]
    # Numerically stable softmax along the expert axis; padded lanes -> exactly 0.
    m = jnp.max(logits, axis=-1, keepdims=True)
    e = jnp.exp(logits - m)
    denom = jnp.sum(e, axis=-1, keepdims=True)
    probs = e / denom                       # exact normalization (free: mem-bound)
    # Only the real expert lanes go back to HBM (out block last dim == full E).
    o_ref[...] = probs[:, :E].astype(o_ref.dtype)


def _choose_batch_tile(B, D, E, block_b):
    """Batch tile: big enough to amortize the ~0.35us per-grid-step overhead,
    small enough to fit double-buffered streamed tiles in VMEM and keep >= 4
    grid steps (so v7x's two TensorCores both get work and can pipeline)."""
    per_row = 2 * 4 * (D + E)               # double-buffered x-in + out-out, f32
    vmem_rows = max(_SUBLANES, _VMEM_TILE_BUDGET // per_row)
    tb = min(block_b, _round_up(B, _SUBLANES), (vmem_rows // _SUBLANES) * _SUBLANES)
    tb = max(tb, _SUBLANES)
    if B > 4 * _SUBLANES:                   # keep >= ~4 grid steps when batch allows
        tb = min(tb, max(_SUBLANES, _round_up(pl.cdiv(B, 4), _SUBLANES)))
    return tb


def gating_network(x, w1, b1, w2, b2, *, block_b=4096):
    """x: (B, D); w1: (D, 64); b1: (1, 64); w2: (64, E); b2: (1, E).

    Returns softmax gating weights of shape (B, E), float32.
    """
    B, D = x.shape
    H = w1.shape[1]
    E = w2.shape[1]

    # Lane-dense expert dim for the in-kernel fc2/softmax only (cheap pads on
    # tiny weight arrays); the HBM output stays (B, E).
    Ep = _round_up(E, _LANES)
    if Ep != E:
        w2 = jnp.pad(w2, ((0, 0), (0, Ep - E)))                        # zero weights
        b2 = jnp.pad(b2, ((0, 0), (0, Ep - E)), constant_values=_NEG_BIG)

    TB = _choose_batch_tile(B, D, E, block_b)
    n_blocks = pl.cdiv(B, TB)     # partial last block handled by Pallas (no jnp.pad)

    cost = pl.CostEstimate(
        flops=2 * B * (D * H + H * Ep),
        transcendentals=B * Ep,
        bytes_accessed=4 * (B * D + B * E + D * H + H + H * Ep + Ep),
    )

    out = pl.pallas_call(
        gating_kernel,
        out_shape=jax.ShapeDtypeStruct((B, E), jnp.float32),
        grid=(n_blocks,),
        in_specs=[
            pl.BlockSpec((TB, D), lambda i: (i, 0)),    # x: streamed per batch tile
            pl.BlockSpec((D, H), lambda i: (0, 0)),     # w1: VMEM-resident
            pl.BlockSpec((1, H), lambda i: (0, 0)),     # b1: resident
            pl.BlockSpec((H, Ep), lambda i: (0, 0)),    # w2 (lane-padded): resident
            pl.BlockSpec((1, Ep), lambda i: (0, 0)),    # b2 (lane-padded): resident
        ],
        out_specs=pl.BlockSpec((TB, E), lambda i: (i, 0)),
        compiler_params=pltpu.CompilerParams(
            dimension_semantics=("parallel",),          # megacore-shard batch tiles
            vmem_limit_bytes=_VMEM_LIMIT_BYTES,
        ),
        cost_estimate=cost,
    )(x, w1, b1, w2, b2)

    return out


def init_params(key, input_dim, num_experts, hidden=HIDDEN):
    """Deterministic init mimicking nn.Linear defaults (uniform +/- 1/sqrt(fan_in))."""
    k1, k2, k3, k4 = jax.random.split(key, 4)
    bound1 = 1.0 / math.sqrt(input_dim)
    bound2 = 1.0 / math.sqrt(hidden)
    # stored as (in_features, out_features), i.e. transposed vs. PyTorch's weight
    w1 = jax.random.uniform(k1, (input_dim, hidden), jnp.float32, -bound1, bound1)
    b1 = jax.random.uniform(k2, (1, hidden), jnp.float32, -bound1, bound1)
    w2 = jax.random.uniform(k3, (hidden, num_experts), jnp.float32, -bound2, bound2)
    b2 = jax.random.uniform(k4, (1, num_experts), jnp.float32, -bound2, bound2)
    return w1, b1, w2, b2


def reference(x, w1, b1, w2, b2):
    h = jnp.maximum(
        jnp.dot(x, w1, precision=lax.Precision.HIGHEST) + b1, 0.0)
    logits = jnp.dot(h, w2, precision=lax.Precision.HIGHEST) + b2
    return jax.nn.softmax(logits, axis=1)


if __name__ == "__main__":
    batch, input_dim, num_experts = 2, 32, 8
    key = jax.random.PRNGKey(0)
    kx, kp = jax.random.split(key)
    x = jax.random.normal(kx, (batch, input_dim), jnp.float32)
    w1, b1, w2, b2 = init_params(kp, input_dim, num_experts)

    out = gating_network(x, w1, b1, w2, b2)
    out = jax.block_until_ready(out)

    ref = reference(x, w1, b1, w2, b2)
    assert out.shape == (batch, num_experts)
    assert jnp.allclose(out, ref, atol=1e-5, rtol=1e-5)
    assert jnp.allclose(jnp.sum(out, axis=1), 1.0, atol=1e-5)
    print("KERNEL_OK")
</pallas_src>

<mosaic_0001>
module attributes {stable_mosaic.version = 11 : i64} {
  func.func @gating_kernel(%arg0: i32, %arg1: memref<8x32xf32, #tpu.memory_space<vmem>>, %arg2: memref<32x64xf32, #tpu.memory_space<vmem>>, %arg3: memref<1x64xf32, #tpu.memory_space<vmem>>, %arg4: memref<64x128xf32, #tpu.memory_space<vmem>>, %arg5: memref<1x128xf32, #tpu.memory_space<vmem>>, %arg6: memref<8x8xf32, #tpu.memory_space<vmem>>) attributes {dimension_semantics = [#tpu.dimension_semantics<parallel>], iteration_bounds = array<i64: 1>, scalar_prefetch = 0 : i64, scratch_operands = 0 : i64, tpu.core_type = #tpu.core_type<tc>, window_params = [{transform_indices = @transform_0, window_bounds = array<i64: 8, 32>}, {pipeline_mode = #tpu.pipeline_mode<synchronous>, transform_indices = @transform_1, window_bounds = array<i64: 32, 64>}, {pipeline_mode = #tpu.pipeline_mode<synchronous>, transform_indices = @transform_2, window_bounds = array<i64: 1, 64>}, {pipeline_mode = #tpu.pipeline_mode<synchronous>, transform_indices = @transform_3, window_bounds = array<i64: 64, 128>}, {pipeline_mode = #tpu.pipeline_mode<synchronous>, transform_indices = @transform_4, window_bounds = array<i64: 1, 128>}, {transform_indices = @transform_5, window_bounds = array<i64: 8, 8>}]} {
    %c0 = arith.constant 0 : index
    %c0_0 = arith.constant 0 : index
    %0 = vector.load %arg1[%c0, %c0_0] : memref<8x32xf32, #tpu.memory_space<vmem>>, vector<8x32xf32>
    %c0_1 = arith.constant 0 : index
    %c0_2 = arith.constant 0 : index
    %1 = vector.load %arg2[%c0_1, %c0_2] : memref<32x64xf32, #tpu.memory_space<vmem>>, vector<32x64xf32>
    %cst = arith.constant dense<0.000000e+00> : vector<8x64xf32>
    %2 = tpu.matmul %0, %1, %cst {dimension_numbers = #tpu.dot_dimension_numbers<[1], [0], [0], [1], [0, 0, 1, 1], [], []>, precision = #tpu.contract_precision<fp32>} : vector<8x32xf32>, vector<32x64xf32>, vector<8x64xf32> -> vector<8x64xf32>
    %c0_3 = arith.constant 0 : index
    %c0_4 = arith.constant 0 : index
    %3 = vector.load %arg3[%c0_3, %c0_4] : memref<1x64xf32, #tpu.memory_space<vmem>>, vector<1x64xf32>
    %4 = vector.broadcast %3 : vector<1x64xf32> to vector<8x64xf32>
    %5 = arith.addf %2, %4 : vector<8x64xf32>
    %cst_5 = arith.constant 0.000000e+00 : f32
    %6 = vector.broadcast %cst_5 : f32 to vector<8x64xf32>
    %7 = arith.maximumf %5, %6 : vector<8x64xf32>
    %c0_6 = arith.constant 0 : index
    %c0_7 = arith.constant 0 : index
    %8 = vector.load %arg4[%c0_6, %c0_7] : memref<64x128xf32, #tpu.memory_space<vmem>>, vector<64x128xf32>
    %cst_8 = arith.constant dense<0.000000e+00> : vector<8x128xf32>
    %9 = tpu.matmul %7, %8, %cst_8 {dimension_numbers = #tpu.dot_dimension_numbers<[1], [0], [0], [1], [0, 0, 1, 1], [], []>, precision = #tpu.contract_precision<fp32>} : vector<8x64xf32>, vector<64x128xf32>, vector<8x128xf32> -> vector<8x128xf32>
    %c0_9 = arith.constant 0 : index
    %c0_10 = arith.constant 0 : index
    %10 = vector.load %arg5[%c0_9, %c0_10] : memref<1x128xf32, #tpu.memory_space<vmem>>, vector<1x128xf32>
    %11 = vector.broadcast %10 : vector<1x128xf32> to vector<8x128xf32>
    %12 = arith.addf %9, %11 : vector<8x128xf32>
    %cst_11 = arith.constant dense<0xFF800000> : vector<8xf32>
    %13 = vector.multi_reduction <maximumf>, %12, %cst_11 [1] : vector<8x128xf32> to vector<8xf32>
    %14 = vector.shape_cast %13 : vector<8xf32> to vector<8x1xf32>
    %15 = vector.broadcast %14 : vector<8x1xf32> to vector<8x128xf32>
    %16 = arith.subf %12, %15 : vector<8x128xf32>
    %17 = math.exp %16 : vector<8x128xf32>
    %cst_12 = arith.constant dense<0.000000e+00> : vector<8xf32>
    %18 = vector.multi_reduction <add>, %17, %cst_12 [1] : vector<8x128xf32> to vector<8xf32>
    %19 = vector.shape_cast %18 : vector<8xf32> to vector<8x1xf32>
    %20 = vector.broadcast %19 : vector<8x1xf32> to vector<8x128xf32>
    %21 = arith.divf %17, %20 : vector<8x128xf32>
    %22 = vector.extract_strided_slice %21 {offsets = [0, 0], sizes = [8, 8], strides = [1, 1]} : vector<8x128xf32> to vector<8x8xf32>
    %c0_13 = arith.constant 0 : index
    %c0_14 = arith.constant 0 : index
    %23 = vector.load %arg6[%c0_13, %c0_14] : memref<8x8xf32, #tpu.memory_space<vmem>>, vector<8x8xf32>
    tpu.vector_store %arg6[%c0_13, %c0_14], %22 {strides = array<i32>} : memref<8x8xf32, #tpu.memory_space<vmem>>, vector<8x8xf32>,
    return
  }
  func.func @transform_0(%arg0: i32) -> (i32, i32) {
    %c0_i32 = arith.constant 0 : i32
    %c0_i32_0 = arith.constant 0 : i32
    return %arg0, %c0_i32 : i32, i32
  }
  func.func @transform_1(%arg0: i32) -> (i32, i32) {
    %c0_i32 = arith.constant 0 : i32
    %c0_i32_0 = arith.constant 0 : i32
    %c0_i32_1 = arith.constant 0 : i32
    return %c0_i32, %c0_i32_0 : i32, i32
  }
  func.func @transform_2(%arg0: i32) -> (i32, i32) {
    %c0_i32 = arith.constant 0 : i32
    %c0_i32_0 = arith.constant 0 : i32
    %c0_i32_1 = arith.constant 0 : i32
    return %c0_i32, %c0_i32_0 : i32, i32
  }
  func.func @transform_3(%arg0: i32) -> (i32, i32) {
    %c0_i32 = arith.constant 0 : i32
    %c0_i32_0 = arith.constant 0 : i32
    %c0_i32_1 = arith.constant 0 : i32
    return %c0_i32, %c0_i32_0 : i32, i32
  }
  func.func @transform_4(%arg0: i32) -> (i32, i32) {
    %c0_i32 = arith.constant 0 : i32
    %c0_i32_0 = arith.constant 0 : i32
    %c0_i32_1 = arith.constant 0 : i32
    return %c0_i32, %c0_i32_0 : i32, i32
  }
  func.func @transform_5(%arg0: i32) -> (i32, i32) {
    %c0_i32 = arith.constant 0 : i32
    %c0_i32_0 = arith.constant 0 : i32
    return %arg0, %c0_i32 : i32, i32
  }
}

</mosaic_0001>

<bundles_post_ra>
// kernel: tpu_custom_call.1
= control target key start
LH: loop header
LB: loop body
LE: loop exit
PB: predicated region body
PF: predicated region fallthrough
CT: control target
= control target key end

     0   :  { %10 = vsyncpa [#allocation3], 0  ;;  %s1837_s0 = inlined_call_operand.hbm [shape: f32[2,32], index: 0, kind: input, shape index: {}]   ;;  %s1838_s1 = inlined_call_operand.hbm [shape: f32[32,64], index: 1, kind: input, shape index: {}]   ;;  %s1839_s2 = inlined_call_operand.vmem [shape: f32[1,64], index: 2, kind: input, shape index: {}]   ;;  %s1840_s3 = inlined_call_operand.hbm [shape: f32[64,128], index: 3, kind: input, shape index: {}]   ;;  %s1841_s4 = inlined_call_operand.vmem [shape: f32[1,128], index: 4, kind: input, shape index: {}]   ;;  %s1842_s5 = inlined_call_operand.hbm [shape: f32[2,8], index: 5, kind: output, shape index: {}]  }
   0x1   :  { %11 = vsyncpa [#allocation6], 0 }
   0x2   :  { %12 = vsyncpa [#allocation4], 0 }
   0x3   :  { %17 = vsyncadd [#allocation3], 96  ;;  %s1515_s18 = smov [#allocation5]  }
   0x4   :  { %s30_s19 = sshll.u32 %s1515_s18, 4  ;;  %s31_s19 = int_to_ptr.vmem [resolvable:$true] %s30_s19 }
   0x5   :  { %s1437_s20 = scalar_lea.vmem %s31_s19, 512  ;;  %p1442_p1 = scmp.lt.s32.totalorder %s31_s19, %s31_s19 }
   0x6   :  { %p1438_p0 = scmp.ne.s32.totalorder %s31_s19, %s1437_s20  ;;  %p1443_p2 = scmp.lt.s32.totalorder %s1437_s20, %s1437_s20 }
   0x8   :  { %p1444_p3 = por %p1443_p2, %p1442_p1 }
   0xa   :  { %p1445_p4 = pnand %p1444_p3, %p1438_p0 }
   0xc   :  { %1448 = shalt.err (!%p1445_p4)
}
   0xd   :  { %s1516_s21 = smov 128   ;;  %s1517_s22 = smov 8  }
   0xe   :  { %36 = dma.hbm_to_vmem [thread:$0]  %s1838_s1, 512, %s31_s19, [#allocation6], %s1516_s21, %s1516_s21, %s1517_s22  }
   0xf   :  { %s1518_s25 = smov [#allocation2]  }
  0x10   :  { %s18_s26 = sshll.u32 %s1518_s25, 4  ;;  %s19_s26 = int_to_ptr.vmem [resolvable:$true] %s18_s26 }
  0x11   :  { %s1457_s27 = scalar_lea.vmem %s19_s26, 32  ;;  %s1461_s28 = scalar_lea.vmem %s19_s26, 128 }
  0x12   :  { %p1458_p5 = scmp.ne.s32.totalorder %s19_s26, %s1457_s27  ;;  %p1462_p6 = scmp.lt.s32.totalorder %s19_s26, %s19_s26 }
  0x13   :  { %p1463_p7 = scmp.lt.s32.totalorder %s1461_s28, %s1457_s27 }
  0x15   :  { %p1464_p8 = por %p1463_p7, %p1462_p6 }
  0x17   :  { %p1465_p9 = pnand %p1464_p8, %p1458_p5 }
  0x19   :  { %1468 = shalt.err (!%p1465_p9)
}
  0x1a   :  { %s1519_s29 = smov 32   ;;  %s1520_s30 = smov 2  }
  0x1b   :  { %24 = dma.hbm_to_vmem [thread:$0]  %s1837_s0, 32, %s19_s26, [#allocation3], %s1519_s29, %s1519_s29, %s1520_s30  }
  0x1c   :  { %s1521_s1 = smov [#allocation7]  }
  0x1d   :  { %s44_s8 = sshll.u32 %s1521_s1, 4  ;;  %s45_s8 = int_to_ptr.vmem [resolvable:$true] %s44_s8 }
  0x1e   :  { %s1477_s9 = scalar_lea.vmem %s45_s8, 1024  ;;  %p1482_p11 = scmp.lt.s32.totalorder %s45_s8, %s45_s8 }
  0x1f   :  { %p1478_p10 = scmp.ne.s32.totalorder %s45_s8, %s1477_s9  ;;  %p1483_p12 = scmp.lt.s32.totalorder %s1477_s9, %s1477_s9 }
  0x21   :  { %p1484_p13 = por %p1483_p12, %p1482_p11 }
  0x23   :  { %p1485_p0 = pnand %p1484_p13, %p1478_p10 }
  0x25   :  { %1488 = shalt.err (!%p1485_p0)
}
  0x26   :  { %50 = dma.hbm_to_vmem [thread:$0]  %s1840_s3, 1024, %s45_s8, [#allocation6], %s1516_s21, %s1516_s21, %s1517_s22  }
  0x27   :  { %1509 = dma.done.wait [#allocation3], 128  }
  0x28   :  { %1510 = vsyncadd [#allocation3], 4294967168 }
  0x29   :  { %1511 = dma.done.wait [#allocation6], 1536  }
  0x2a   :  { %1512 = vsyncadd [#allocation6], 4294965760  ;;  %v1522_v0 = vmov 0.0   ;;  %vm1523_vm0 = vmmov 0   ;;  %vm74_vm1 = vcmask 261120   ;;  %v66_v1 = vld [vmem:[#allocation5 + $0x18] sm:$0xff] }
  0x2b   :  { %1235 = vmatprep.subr.mxu0 %v1522_v0  ;;  %1246 = vmatprep.subr.mxu1 %v1522_v0  ;;  %v65_v2 = vld [vmem:[#allocation5 + $0x10] sm:$0xff]  ;;  %v64_v3 = vld [vmem:[#allocation5 + $0x8] sm:$0xff]  ;;  %v1579_v4 = vand.u32 4294901760, %v66_v1  ;;  %v63_v7 = vld [vmem:[#allocation5] sm:$0xff]  ;;  %vm579_vm2 = vcmask 523264   ;;  %vm1129_vm3 = vcmask 64512  }
  0x2c   :  { %1243 = vmatprep.mubr.msk.f32.mxu0 %vm1523_vm0, %v1522_v0  ;;  %1254 = vmatprep.mubr.msk.f32.mxu1 %vm1523_vm0, %v1522_v0  ;;  %v1581_v5 = vand.u32 4294901760, %v65_v2  ;;  %v1583_v6 = vand.u32 4294901760, %v64_v3  ;;  %v62_v8 = vld [vmem:[#allocation2] sm:$0xff]  ;;  %v1585_v9 = vand.u32 4294901760, %v63_v7  ;;  %v570_v34 = vld [vmem:[#allocation7 + $0x30] sm:$0xff]  ;;  %v569_v37 = vld [vmem:[#allocation7 + $0x28] sm:$0xff] }
  0x2d   :  { %v76_v10 = vsel %vm74_vm1, %v62_v8, 0  ;;  %1236 = vmatpush3.msra.mxu0 %v1579_v4  ;;  %v183_v11 = vsub.f32 %v66_v1, %v1579_v4  ;;  %v571_v32 = vld [vmem:[#allocation7 + $0x38] sm:$0xff]  ;;  %v1650_v36 = vand.u32 4294901760, %v570_v34  ;;  %v1658_v40 = vand.u32 4294901760, %v569_v37  ;;  %v568_v41 = vld [vmem:[#allocation7 + $0x20] sm:$0xff]  ;;  %v566_v52 = vld [vmem:[#allocation7 + $0x10] sm:$0xff] }
  0x2e   :  { %v1589_v12 = vand.u32 4294901760, %v76_v10  ;;  %v190_v13 = vsub.f32 %v65_v2, %v1581_v5  ;;  %v197_v14 = vsub.f32 %v64_v3, %v1583_v6  ;;  %1237 = vmatprep.subr.mxu0 %v1522_v0  ;;  %v204_v15 = vsub.f32 %v63_v7, %v1585_v9  ;;  %v567_v46 = vld [vmem:[#allocation7 + $0x18] sm:$0xff]  ;;  %v565_v58 = vld [vmem:[#allocation7 + $0x8] sm:$0xff]  ;;  %v564_v1 = vld [vmem:[#allocation7] sm:$0xff] }
  0x2f   :  { %1238 = vmatpush3.msra.mxu0 %v1581_v5  ;;  %v184_v16 = vand.u32 4294901760, %v183_v11  ;;  %v1645_v33 = vand.u32 4294901760, %v571_v32  ;;  %v1656_v39 = vsub.f32 %v570_v34, %v1650_v36  ;;  %v1667_v44 = vsub.f32 %v569_v37, %v1658_v40 }
  0x30   :  { %v148_v17 = vsub.f32 %v76_v10, %v1589_v12  ;;  %v191_v18 = vand.u32 4294901760, %v190_v13  ;;  %v198_v19 = vand.u32 4294901760, %v197_v14  ;;  %1239 = vmatprep.subr.mxu0 %v1522_v0  ;;  %v205_v20 = vand.u32 4294901760, %v204_v15 }
  0x31   :  { %1240 = vmatpush3.msra.mxu0 %v1583_v6  ;;  %v185_v21 = vsub.f32 %v183_v11, %v184_v16  ;;  %v1648_v35 = vsub.f32 %v571_v32, %v1645_v33  ;;  %v692_v43 = vand.u32 4294901760, %v1656_v39  ;;  %v1669_v45 = vand.u32 4294901760, %v568_v41 }
  0x32   :  { %v149_v22 = vand.u32 4294901760, %v148_v17  ;;  %v192_v23 = vsub.f32 %v190_v13, %v191_v18  ;;  %v199_v24 = vsub.f32 %v197_v14, %v198_v19  ;;  %1241 = vmatprep.subr.mxu0 %v1522_v0  ;;  %v206_v28 = vsub.f32 %v204_v15, %v205_v20 }
  0x33   :  { %1242 = vmatpush3.msra.mxu0 %v1585_v9  ;;  %v186_v25 = vand.u32 4294901760, %v185_v21  ;;  %v685_v38 = vand.u32 4294901760, %v1648_v35  ;;  %v693_v48 = vsub.f32 %v1656_v39, %v692_v43  ;;  %v699_v49 = vand.u32 4294901760, %v1667_v44 }
  0x34   :  { %v150_v26 = vsub.f32 %v148_v17, %v149_v22  ;;  %v193_v27 = vand.u32 4294901760, %v192_v23  ;;  %1257 = vmatprep.subr.mxu0 %v1522_v0  ;;  %v200_v30 = vand.u32 4294901760, %v199_v24  ;;  %v207_v31 = vand.u32 4294901760, %v206_v28 }
  0x35   :  { %1247 = vmatpush3.msra.mxu1 %v186_v25  ;;  %v686_v42 = vsub.f32 %v1648_v35, %v685_v38  ;;  %v1678_v50 = vsub.f32 %v568_v41, %v1669_v45  ;;  %v1681_v51 = vand.u32 4294901760, %v567_v46  ;;  %v694_v53 = vand.u32 4294901760, %v693_v48 }
  0x36   :  { %v151_v29 = vand.u32 4294901760, %v150_v26  ;;  %1248 = vmatprep.subr.mxu1 %v1522_v0  ;;  %v700_v54 = vsub.f32 %v1667_v44, %v699_v49  ;;  %v1688_v56 = vand.u32 4294901760, %v566_v52  ;;  %v1701_v62 = vand.u32 4294901760, %v565_v58 }
  0x37   :  { %1249 = vmatpush3.msra.mxu1 %v193_v27  ;;  %v687_v47 = vand.u32 4294901760, %v686_v42  ;;  %v706_v55 = vand.u32 4294901760, %v1678_v50  ;;  %v1692_v57 = vsub.f32 %v567_v46, %v1681_v51 }
  0x38   :  { %1244 = vmatmul.mubr.f32.vlgmr.msra.gmra.mxu0 %v151_v29  ;;  %1250 = vmatprep.subr.mxu1 %v1522_v0  ;;  %v701_v59 = vand.u32 4294901760, %v700_v54  ;;  %v1699_v61 = vsub.f32 %v566_v52, %v1688_v56 }
  0x39   :  { %1258 = vmatpush3.msra.mxu0 %v183_v11  ;;  %1251 = vmatpush3.msra.mxu1 %v200_v30  ;;  %v707_v60 = vsub.f32 %v1678_v50, %v706_v55  ;;  %v713_v63 = vand.u32 4294901760, %v1692_v57 }
  0x3a   :  { %1259 = vmatprep.subr.mxu0 %v1522_v0  ;;  %1252 = vmatprep.subr.mxu1 %v1522_v0  ;;  %v720_v3 = vand.u32 4294901760, %v1699_v61 }
  0x3b   :  { %1260 = vmatpush3.msra.mxu0 %v190_v13  ;;  %1253 = vmatpush3.msra.mxu1 %v207_v31  ;;  %v708_v2 = vand.u32 4294901760, %v707_v60 }
  0x3c   :  { %1261 = vmatprep.subr.mxu0 %v1522_v0  ;;  %1255 = vmatmul.mubr.f32.vlgmr.msra.gmra.mxu1 %v1589_v12  ;;  %v721_v7 = vsub.f32 %v1699_v61, %v720_v3 }
  0x3d   :  { %1262 = vmatpush3.msra.mxu0 %v197_v14  ;;  %1268 = vmatprep.subr.mxu1 %v1522_v0 }
  0x3e   :  { %1263 = vmatprep.subr.mxu0 %v1522_v0  ;;  %1269 = vmatpush3.msra.mxu1 %v1579_v4  ;;  %v722_v11 = vand.u32 4294901760, %v721_v7 }
  0x3f   :  { %1264 = vmatpush3.msra.mxu0 %v204_v15  ;;  %1265 = vmatprep.mubr.msk.f32.mxu0 %vm1523_vm0, %v1522_v0 }
  0x40   :  { %1270 = vmatprep.subr.mxu1 %v1522_v0  ;;  %1279 = vmatprep.subr.mxu0 %v1522_v0 }
  0x41   :  { %1266 = vmatmul.mubr.f32.vlgmr.msra.gmra.mxu0 %v148_v17  ;;  %1271 = vmatpush3.msra.mxu1 %v1581_v5 }
  0x42   :  { %1280 = vmatpush3.msra.mxu0 %v184_v16  ;;  %1272 = vmatprep.subr.mxu1 %v1522_v0 }
  0x43   :  { %1281 = vmatprep.subr.mxu0 %v1522_v0  ;;  %1273 = vmatpush3.msra.mxu1 %v1583_v6 }
  0x44   :  { %1282 = vmatpush3.msra.mxu0 %v191_v18  ;;  %1274 = vmatprep.subr.mxu1 %v1522_v0 }
  0x45   :  { %1283 = vmatprep.subr.mxu0 %v1522_v0  ;;  %1275 = vmatpush3.msra.mxu1 %v1585_v9 }
  0x46   :  { %1276 = vmatprep.mubr.msk.f32.mxu1 %vm1523_vm0, %v1522_v0  ;;  %1284 = vmatpush3.msra.mxu0 %v198_v19 }
  0x47   :  { %1277 = vmatmul.mubr.f32.vlgmr.msra.gmra.mxu1 %v149_v22  ;;  %1285 = vmatprep.subr.mxu0 %v1522_v0 }
  0x48   :  { %1290 = vmatprep.subr.mxu1 %v1522_v0  ;;  %1286 = vmatpush3.msra.mxu0 %v205_v20  ;;  %v1149_v20 = vld [vmem:[%s1839_s2] ss:$0 sm:$0xff] }
  0x49   :  { %1287 = vmatprep.mubr.msk.f32.mxu0 %vm1523_vm0, %v1522_v0  ;;  %1291 = vmatpush3.msra.mxu1 %v1579_v4  ;;  %v1709_v4 = vsub.f32 %v565_v58, %v1701_v62 }
  0x4a   :  { %1288 = vmatmul.mubr.f32.vlgmr.msra.gmra.mxu0 %v1589_v12  ;;  %1292 = vmatprep.subr.mxu1 %v1522_v0 }
  0x4b   :  { %1298 = vmatprep.mubr.msk.f32.mxu1 %vm1523_vm0, %v1522_v0  ;;  %1293 = vmatpush3.msra.mxu1 %v1581_v5  ;;  %v1711_v5 = vand.u32 4294901760, %v564_v1  ;;  %v727_v8 = vand.u32 4294901760, %v1709_v4 }
  0x4c   :  { %1301 = vmatprep.subr.mxu0 %v1522_v0  ;;  %1294 = vmatprep.subr.mxu1 %v1522_v0 }
  0x4d   :  { %1317 = vmatprep.mubr.msk.f32.mxu0 %vm1523_vm0, %v1522_v0  ;;  %1295 = vmatpush3.msra.mxu1 %v1583_v6  ;;  %v714_v6 = vsub.f32 %v1692_v57, %v713_v63 }
  0x4e   :  { %1296 = vmatprep.subr.mxu1 %v1522_v0  ;;  %1302 = vmatpush3.msra.mxu0 %v1645_v33 }
  0x4f   :  { %1297 = vmatpush3.msra.mxu1 %v1585_v9  ;;  %1303 = vmatprep.subr.mxu0 %v1522_v0  ;;  %v1724_v9 = vsub.f32 %v564_v1, %v1711_v5  ;;  %v715_v10 = vand.u32 4294901760, %v714_v6 }
  0x50   :  { %1299 = vmatmul.mubr.f32.vlgmr.msra.gmra.mxu1 %v1589_v12  ;;  %1320 = vmatprep.subr.mxu1 %v1522_v0  ;;  %v728_v12 = vsub.f32 %v1709_v4, %v727_v8 }
  0x51   :  { %1336 = vmatprep.mubr.msk.f32.mxu1 %vm1523_vm0, %v1522_v0  ;;  %1304 = vmatpush3.msra.mxu0 %v1650_v36  ;;  %v734_v13 = vand.u32 4294901760, %v1724_v9 }
  0x52   :  { %1305 = vmatprep.subr.mxu0 %v1522_v0  ;;  %1321 = vmatpush3.msra.mxu1 %v687_v47  ;;  %v729_v14 = vand.u32 4294901760, %v728_v12 }
  0x53   :  { %1306 = vmatpush3.msra.mxu0 %v1658_v40  ;;  %1322 = vmatprep.subr.mxu1 %v1522_v0  ;;  %v735_v15 = vsub.f32 %v1724_v9, %v734_v13 }
  0x54   :  { %1307 = vmatprep.subr.mxu0 %v1522_v0  ;;  %1323 = vmatpush3.msra.mxu1 %v694_v53 }
  0x55   :  { %1308 = vmatpush3.msra.mxu0 %v1669_v45  ;;  %1324 = vmatprep.subr.mxu1 %v1522_v0  ;;  %v736_v16 = vand.u32 4294901760, %v735_v15 }
  0x56   :  { %1309 = vmatprep.subr.mxu0 %v1522_v0  ;;  %1325 = vmatpush3.msra.mxu1 %v701_v59 }
  0x57   :  { %1310 = vmatpush3.msra.mxu0 %v1681_v51  ;;  %1326 = vmatprep.subr.mxu1 %v1522_v0 }
  0x58   :  { %1311 = vmatprep.subr.mxu0 %v1522_v0  ;;  %1327 = vmatpush3.msra.mxu1 %v708_v2 }
  0x59   :  { %1312 = vmatpush3.msra.mxu0 %v1688_v56  ;;  %1328 = vmatprep.subr.mxu1 %v1522_v0 }
  0x5a   :  { %1313 = vmatprep.subr.mxu0 %v1522_v0  ;;  %1329 = vmatpush3.msra.mxu1 %v715_v10 }
  0x5b   :  { %1314 = vmatpush3.msra.mxu0 %v1701_v62  ;;  %1330 = vmatprep.subr.mxu1 %v1522_v0 }
  0x5c   :  { %1315 = vmatprep.subr.mxu0 %v1522_v0  ;;  %1331 = vmatpush3.msra.mxu1 %v722_v11 }
  0x5d   :  { %1316 = vmatpush3.msra.mxu0 %v1711_v5  ;;  %1332 = vmatprep.subr.mxu1 %v1522_v0 }
  0x5e   :  { %1339 = vmatprep.subr.mxu0 %v1522_v0  ;;  %1333 = vmatpush3.msra.mxu1 %v729_v14 }
  0x5f   :  { %1334 = vmatprep.subr.mxu1 %v1522_v0 }
  0x60   :  { %1335 = vmatpush3.msra.mxu1 %v736_v16 }
  0x61   :  { %1358 = vmatprep.subr.mxu1 %v1522_v0 }
  0xf8   :  { %v153_v17 = vpop.f32.mrf.mxu0 }
  0xf9   :  { %v154_v23 = vadd.f32 %v1149_v20, %v153_v17 }
  0xfa   :  { %v1245_v18 = vpop.f32.mrf.mxu0 }
  0xfc   :  { %v244_v19 = vpop.f32.mrf.mxu1 }
  0xfd   :  { %v245_v25 = vadd.f32 %v244_v19, %v154_v23 }
  0xfe   :  { %v1256_v21 = vpop.f32.mrf.mxu1 }
 0x101   :  { %v324_v22 = vpop.f32.mrf.mxu0 }
 0x102   :  { %v325_v28 = vadd.f32 %v324_v22, %v245_v25 }
 0x103   :  { %v1267_v24 = vpop.f32.mrf.mxu0 }
 0x107   :  { %v401_v26 = vpop.f32.mrf.mxu1 }
 0x108   :  { %v402_v30 = vadd.f32 %v401_v26, %v325_v28 }
 0x109   :  { %v1278_v27 = vpop.f32.mrf.mxu1 }
 0x10a   :  { %v484_v29 = vpop.f32.mrf.mxu0 }
 0x10b   :  { %v485_v32 = vadd.f32 %v484_v29, %v402_v30 }
 0x10c   :  { %v1289_v31 = vpop.f32.mrf.mxu0 }
 0x110   :  { %v559_v34 = vpop.f32.mrf.mxu1 }
 0x111   :  { %v560_v37 = vadd.f32 %v559_v34, %v485_v32 }
 0x112   :  { %v1300_v41 = vpop.f32.mrf.mxu1 }
 0x113   :  { %v563_v42 = vmax.f32 %v560_v37, 0.0 }
 0x115   :  { %v581_v46 = vsel %vm579_vm2, %v563_v42, 0 }
 0x116   :  { %v1744_v47 = vand.u32 4294901760, %v581_v46 }
 0x118   :  { %v657_v48 = vsub.f32 %v581_v46, %v1744_v47  ;;  %1337 = vmatmul.mubr.f32.vlgmr.msra.gmra.mxu1 %v1744_v47 }
 0x119   :  { %1359 = vmatpush3.msra.mxu1 %v1645_v33  ;;  %1374 = vmatprep.mubr.msk.f32.mxu1 %vm1523_vm0, %v1522_v0 }
 0x11a   :  { %v658_v52 = vand.u32 4294901760, %v657_v48  ;;  %1360 = vmatprep.subr.mxu1 %v1522_v0 }
 0x11b   :  { %1361 = vmatpush3.msra.mxu1 %v1650_v36 }
 0x11c   :  { %1362 = vmatprep.subr.mxu1 %v1522_v0  ;;  %v659_v53 = vsub.f32 %v657_v48, %v658_v52 }
 0x11d   :  { %1363 = vmatpush3.msra.mxu1 %v1658_v40 }
 0x11e   :  { %1364 = vmatprep.subr.mxu1 %v1522_v0  ;;  %v660_v54 = vand.u32 4294901760, %v659_v53 }
 0x11f   :  { %1365 = vmatpush3.msra.mxu1 %v1669_v45 }
 0x120   :  { %1366 = vmatprep.subr.mxu1 %v1522_v0  ;;  %1318 = vmatmul.mubr.f32.vlgmr.msra.gmra.mxu0 %v660_v54 }
 0x121   :  { %1340 = vmatpush3.msra.mxu0 %v1648_v35  ;;  %1367 = vmatpush3.msra.mxu1 %v1681_v51 }
 0x122   :  { %1341 = vmatprep.subr.mxu0 %v1522_v0  ;;  %1368 = vmatprep.subr.mxu1 %v1522_v0 }
 0x123   :  { %1342 = vmatpush3.msra.mxu0 %v1656_v39  ;;  %1369 = vmatpush3.msra.mxu1 %v1688_v56 }
 0x124   :  { %1343 = vmatprep.subr.mxu0 %v1522_v0  ;;  %1370 = vmatprep.subr.mxu1 %v1522_v0 }
 0x125   :  { %1344 = vmatpush3.msra.mxu0 %v1667_v44  ;;  %1371 = vmatpush3.msra.mxu1 %v1701_v62 }
 0x126   :  { %1345 = vmatprep.subr.mxu0 %v1522_v0  ;;  %1372 = vmatprep.subr.mxu1 %v1522_v0 }
 0x127   :  { %1346 = vmatpush3.msra.mxu0 %v1678_v50  ;;  %1373 = vmatpush3.msra.mxu1 %v1711_v5 }
 0x128   :  { %1347 = vmatprep.subr.mxu0 %v1522_v0  ;;  %1375 = vmatmul.mubr.f32.vlgmr.msra.gmra.mxu1 %v658_v52 }
 0x129   :  { %1396 = vmatprep.subr.mxu1 %v1522_v0  ;;  %1348 = vmatpush3.msra.mxu0 %v1692_v57 }
 0x12a   :  { %1397 = vmatpush3.msra.mxu1 %v1645_v33  ;;  %1349 = vmatprep.subr.mxu0 %v1522_v0 }
 0x12b   :  { %1398 = vmatprep.subr.mxu1 %v1522_v0  ;;  %1350 = vmatpush3.msra.mxu0 %v1699_v61 }
 0x12c   :  { %1399 = vmatpush3.msra.mxu1 %v1650_v36  ;;  %1351 = vmatprep.subr.mxu0 %v1522_v0 }
 0x12d   :  { %1400 = vmatprep.subr.mxu1 %v1522_v0  ;;  %1352 = vmatpush3.msra.mxu0 %v1709_v4 }
 0x12e   :  { %1401 = vmatpush3.msra.mxu1 %v1658_v40  ;;  %1353 = vmatprep.subr.mxu0 %v1522_v0 }
 0x12f   :  { %1402 = vmatprep.subr.mxu1 %v1522_v0  ;;  %1354 = vmatpush3.msra.mxu0 %v1724_v9 }
 0x130   :  { %1355 = vmatprep.mubr.msk.f32.mxu0 %vm1523_vm0, %v1522_v0  ;;  %1403 = vmatpush3.msra.mxu1 %v1669_v45  ;;  %v1150_v45 = vld [vmem:[%s1841_s4] ss:$0 sm:$0xff] }
 0x131   :  { %1356 = vmatmul.mubr.f32.vlgmr.msra.gmra.mxu0 %v657_v48  ;;  %1377 = vmatprep.subr.mxu0 %v1522_v0 }
 0x132   :  { %1404 = vmatprep.subr.mxu1 %v1522_v0  ;;  %1378 = vmatpush3.msra.mxu0 %v685_v38 }
 0x133   :  { %1405 = vmatpush3.msra.mxu1 %v1681_v51  ;;  %1379 = vmatprep.subr.mxu0 %v1522_v0 }
 0x134   :  { %1406 = vmatprep.subr.mxu1 %v1522_v0  ;;  %1380 = vmatpush3.msra.mxu0 %v692_v43 }
 0x135   :  { %1407 = vmatpush3.msra.mxu1 %v1688_v56  ;;  %1381 = vmatprep.subr.mxu0 %v1522_v0 }
 0x136   :  { %1408 = vmatprep.subr.mxu1 %v1522_v0  ;;  %1382 = vmatpush3.msra.mxu0 %v699_v49 }
 0x137   :  { %1409 = vmatpush3.msra.mxu1 %v1701_v62  ;;  %1383 = vmatprep.subr.mxu0 %v1522_v0 }
 0x138   :  { %1410 = vmatprep.subr.mxu1 %v1522_v0  ;;  %1384 = vmatpush3.msra.mxu0 %v706_v55 }
 0x139   :  { %1411 = vmatpush3.msra.mxu1 %v1711_v5  ;;  %1412 = vmatprep.mubr.msk.f32.mxu1 %vm1523_vm0, %v1522_v0 }
 0x13a   :  { %1385 = vmatprep.subr.mxu0 %v1522_v0  ;;  %1413 = vmatmul.mubr.f32.vlgmr.msra.gmra.mxu1 %v1744_v47 }
 0x13b   :  { %1386 = vmatpush3.msra.mxu0 %v713_v63  ;;  %1393 = vmatprep.mubr.msk.f32.mxu0 %vm1523_vm0, %v1522_v0 }
 0x13c   :  { %1387 = vmatprep.subr.mxu0 %v1522_v0 }
 0x13d   :  { %1388 = vmatpush3.msra.mxu0 %v720_v3 }
 0x13e   :  { %1389 = vmatprep.subr.mxu0 %v1522_v0 }
 0x13f   :  { %1390 = vmatpush3.msra.mxu0 %v727_v8 }
 0x140   :  { %1391 = vmatprep.subr.mxu0 %v1522_v0 }
 0x141   :  { %1392 = vmatpush3.msra.mxu0 %v734_v13 }
 0x142   :  { %1394 = vmatmul.mubr.f32.vlgmr.msra.gmra.mxu0 %v1744_v47 }
 0x1d8   :  { %v773_v33 = vpop.f32.mrf.mxu1 }
 0x1da   :  { %v1338_v35 = vpop.f32.mrf.mxu1 }
 0x1e0   :  { %v662_v36 = vpop.f32.mrf.mxu0 }
 0x1e1   :  { %v663_v49 = vadd.f32 %v1150_v45, %v662_v36 }
 0x1e2   :  { %v1319_v38 = vpop.f32.mrf.mxu0 }
 0x1e3   :  { %v774_v0 = vadd.f32 %v773_v33, %v663_v49 }
 0x1e8   :  { %v942_v39 = vpop.f32.mrf.mxu1 }
 0x1ea   :  { %v1376_v40 = vpop.f32.mrf.mxu1 }
 0x1f1   :  { %v861_v43 = vpop.f32.mrf.mxu0 }
 0x1f2   :  { %v862_v55 = vadd.f32 %v861_v43, %v774_v0 }
 0x1f3   :  { %v1357_v44 = vpop.f32.mrf.mxu0 }
 0x1f4   :  { %v943_v56 = vadd.f32 %v942_v39, %v862_v55 }
 0x1fa   :  { %v1116_v50 = vpop.f32.mrf.mxu1 }
 0x1fc   :  { %v1414_v51 = vpop.f32.mrf.mxu1 }
 0x202   :  { %v1037_v57 = vpop.f32.mrf.mxu0 }
 0x203   :  { %v1038_v58 = vadd.f32 %v1037_v57, %v943_v56 }
 0x204   :  { %v1395_v59 = vpop.f32.mrf.mxu0 }
 0x205   :  { %v1117_v60 = vadd.f32 %v1116_v50, %v1038_v58 }
 0x207   :  { %1120 = vmax.xlane.f32.xlu0 %v1117_v60 }
 0x290   :  { %v1121_v61 = vpop.xlane.xlu0 %1120 }
 0x291   :  { %v1122_v62 = vsub.f32 %v1117_v60, %v1121_v61 }
 0x293   :  { %v1123_v63 = vmul.f32 1.442695, %v1122_v62 }
 0x295   :  { %1425 = vpow2.f32 %v1123_v63 }
 0x2a2   :  { %v1426_v1 = vpop.eup %1425 }
 0x2a3   :  { %1125 = vadd.xlane.f32.xlu0 %v1426_v1 }
 0x32c   :  { %v1126_v2 = vpop.xlane.xlu0 %1125 }
 0x32d   :  { %1427 = vrcp.f32 %v1126_v2 }
 0x33a   :  { %v1428_v3 = vpop.eup %1427 }
 0x33b   :  { %v1128_v4 = vmul.f32 %v1428_v3, %v1426_v1 }
 0x33d   :  { %1130 = vst.msk [vmem:[#allocation8] sm:$0xff] %vm1129_vm3, %v1128_v4 }
 0x33e   :  { %1135 = vsyncadd [#allocation4], 96  ;;  %s1524_s4 = smov [#allocation8]  }
 0x33f   :  { %s1136_s13 = sshll.u32 %s1524_s4, 4  ;;  %s1137_s13 = int_to_ptr.vmem [resolvable:$true] %s1136_s13 }
 0x340   :  { %s1489_s14 = scalar_lea.vmem %s1137_s13, 32  ;;  %s1493_s15 = scalar_lea.vmem %s1137_s13, 128 }
 0x341   :  { %p1490_p1 = scmp.ne.s32.totalorder %s1137_s13, %s1489_s14  ;;  %p1494_p2 = scmp.lt.s32.totalorder %s1137_s13, %s1137_s13 }
 0x342   :  { %p1495_p3 = scmp.lt.s32.totalorder %s1493_s15, %s1489_s14 }
 0x344   :  { %p1496_p4 = por %p1495_p3, %p1494_p2 }
 0x346   :  { %p1497_p5 = pnand %p1496_p4, %p1490_p1 }
 0x348   :  { %1500 = shalt.err (!%p1497_p5)
}
 0x349   :  { %1142 = dma.vmem_to_hbm [thread:$0]  %s1137_s13, 32, %s1842_s5, [#allocation4], %s1519_s29, %s1519_s29, %s1520_s30  }
 0x34a   :  { %1513 = dma.done.wait [#allocation4], 128  }
 0x34b   :  { %1514 = vsyncadd [#allocation4], 4294967168 }
 0x34c   :  { %1146 = vsyncpa [#allocation3], 1 }
 0x34d   :  { %1147 = vsyncpa [#allocation6], 1 }
 0x34e   :  { %1148 = vsyncpa [#allocation4], 1 }

</bundles_post_ra>
